<compile_context>
chip_gen: v5e
topology: v5e:2x2
jax: 0.10.0
libtpu: 0.0.40
codegen_flags: <defaults>
</compile_context>

<pallas_src>
import jax
import jax.numpy as jnp
from jax.experimental import pallas as pl
from jax.experimental.pallas import tpu as pltpu


def eigendnn_kernel(x_ref, w0t_ref, b0_ref, w1t_ref, b1_ref, w2t_ref, b2_ref,
                    out_ref):
    # Batch-on-lanes layout: x_ref is (D, TB), out_ref is (O, TB).
    # layer_0: W0t (H, D) @ x (D, TB) + b0_eff (H, 1), Tanh
    h = (jnp.dot(w0t_ref[...], x_ref[...], preferred_element_type=jnp.float32)
         + b0_ref[...])
    h = jnp.tanh(h)

    # layer_1: W1t (H, H) @ h (H, TB) + b1 (H, 1), Tanh
    h = (jnp.dot(w1t_ref[...], h, preferred_element_type=jnp.float32)
         + b1_ref[...])
    h = jnp.tanh(h)

    # layer_2: W2t (O, H) @ h (H, TB) + b2 (O, 1)   (no activation)
    o = (jnp.dot(w2t_ref[...], h, preferred_element_type=jnp.float32)
         + b2_ref[...])
    out_ref[...] = o.astype(out_ref.dtype)


def eigendnn_forward(x, params, tb=256):
    """x: (B, D_in) float32. params: dict of transposed weights / biases.

    Returns (out, eigenvalue) matching the PyTorch module's forward.
    """
    B, D = x.shape
    H = params["w0"].shape[1]
    O = params["w2"].shape[1]

    eig_w = params["eig_w"][0, 0]
    # eigenvalue = ones(B,1) @ W_eig.T == scalar broadcast; done in the wrapper.
    eig = jnp.full((B, 1), eig_w, dtype=jnp.float32)

    # Fold the eigenvalue column of W0 into the first bias:
    #   concat([x, eig]) @ W0 + b0  ==  x @ W0[:D] + (b0 + eig_w * W0[D])
    b0_eff = params["b0"] + eig_w * params["w0"][D, :]

    # Transposed weights (out_features, in_features) so the kernel computes W @ x
    # with the batch on the lane axis.
    w0t = params["w0"][:D, :].T.astype(jnp.float32)   # (H, D)
    w1t = params["w1"].T.astype(jnp.float32)          # (H, H)
    w2t = params["w2"].T.astype(jnp.float32)          # (O, H)
    b0c = b0_eff.reshape(H, 1).astype(jnp.float32)
    b1c = params["b1"].reshape(H, 1).astype(jnp.float32)
    b2c = params["b2"].reshape(O, 1).astype(jnp.float32)

    # Batch on lanes: pad B up to a multiple of tb (tb itself multiple of 256).
    b_pad = max(tb, ((B + tb - 1) // tb) * tb)
    x_t = jnp.zeros((D, b_pad), jnp.float32).at[:, :B].set(x.T.astype(jnp.float32))

    grid = (b_pad // tb,)

    def const_spec(shape):
        return pl.BlockSpec(shape, lambda i: (0, 0))

    out_t = pl.pallas_call(
        eigendnn_kernel,
        grid=grid,
        in_specs=[
            pl.BlockSpec((D, tb), lambda i: (0, i)),   # x tile (batch on lanes)
            const_spec((H, D)),                        # w0t (VMEM-resident)
            const_spec((H, 1)),                        # b0_eff
            const_spec((H, H)),                        # w1t
            const_spec((H, 1)),                        # b1
            const_spec((O, H)),                        # w2t
            const_spec((O, 1)),                        # b2
        ],
        out_specs=pl.BlockSpec((O, tb), lambda i: (0, i)),
        out_shape=jax.ShapeDtypeStruct((O, b_pad), jnp.float32),
        compiler_params=pltpu.CompilerParams(
            dimension_semantics=("parallel",)),        # shards across v7x's 2 TCs
    )(x_t, w0t, b0c, w1t, b1c, w2t, b2c)

    out = out_t[:, :B].T
    return out, eig


def init_params(key, layers, start_eigenvalue=1.0):
    """Deterministic init. Weights stored transposed: (in_features, out_features)."""
    d_in, h0, h1, d_out = layers
    ks = jax.random.split(key, 6)
    params = {
        "eig_w": jnp.full((1, 1), start_eigenvalue, dtype=jnp.float32),
        # layer_0 takes the concatenated (x, eigenvalue) => d_in + 1 inputs
        "w0": jax.random.normal(ks[0], (d_in + 1, h0), jnp.float32) * 0.2,
        "b0": jax.random.normal(ks[1], (h0,), jnp.float32) * 0.1,
        "w1": jax.random.normal(ks[2], (h0, h1), jnp.float32) * 0.2,
        "b1": jax.random.normal(ks[3], (h1,), jnp.float32) * 0.1,
        "w2": jax.random.normal(ks[4], (h1, d_out), jnp.float32) * 0.2,
        "b2": jax.random.normal(ks[5], (d_out,), jnp.float32) * 0.1,
    }
    return params


def reference_forward(x, params):
    """Pure-JAX reference identical to the PyTorch forward."""
    B = x.shape[0]
    eig = jnp.ones((B, 1), jnp.float32) @ params["eig_w"].T  # Linear(1,1,bias=False)
    inp = jnp.concatenate([x, eig], axis=1)
    h = jnp.tanh(inp @ params["w0"] + params["b0"])
    h = jnp.tanh(h @ params["w1"] + params["b1"])
    out = h @ params["w2"] + params["b2"]
    return out, eig


if __name__ == "__main__":
    layers = [4, 32, 32, 2]
    B = 512  # multiple of the 256-wide batch tile -> 2 pipelined grid steps

    key = jax.random.PRNGKey(0)
    kx, kp = jax.random.split(key)
    x = jax.random.normal(kx, (B, layers[0]), jnp.float32)
    params = init_params(kp, layers, start_eigenvalue=1.0)

    out, eig = eigendnn_forward(x, params)
    out = jax.block_until_ready(out)
    eig = jax.block_until_ready(eig)

    out_ref, eig_ref = reference_forward(x, params)
    assert jnp.allclose(out, out_ref, atol=1e-5, rtol=1e-5), "output mismatch"
    assert jnp.allclose(eig, eig_ref, atol=1e-6, rtol=1e-6), "eigenvalue mismatch"

    print("KERNEL_OK")
</pallas_src>

<mosaic_0001>
module attributes {stable_mosaic.version = 11 : i64} {
  func.func @eigendnn_kernel(%arg0: i32, %arg1: memref<4x256xf32, #tpu.memory_space<vmem>>, %arg2: memref<32x4xf32, #tpu.memory_space<vmem>>, %arg3: memref<32x1xf32, #tpu.memory_space<vmem>>, %arg4: memref<32x32xf32, #tpu.memory_space<vmem>>, %arg5: memref<32x1xf32, #tpu.memory_space<vmem>>, %arg6: memref<2x32xf32, #tpu.memory_space<vmem>>, %arg7: memref<2x1xf32, #tpu.memory_space<vmem>>, %arg8: memref<2x256xf32, #tpu.memory_space<vmem>>) attributes {dimension_semantics = [#tpu.dimension_semantics<parallel>], iteration_bounds = array<i64: 2>, scalar_prefetch = 0 : i64, scratch_operands = 0 : i64, tpu.core_type = #tpu.core_type<tc>, window_params = [{transform_indices = @transform_0, window_bounds = array<i64: 4, 256>}, {pipeline_mode = #tpu.pipeline_mode<synchronous>, transform_indices = @transform_1, window_bounds = array<i64: 32, 4>}, {pipeline_mode = #tpu.pipeline_mode<synchronous>, transform_indices = @transform_2, window_bounds = array<i64: 32, 1>}, {pipeline_mode = #tpu.pipeline_mode<synchronous>, transform_indices = @transform_3, window_bounds = array<i64: 32, 32>}, {pipeline_mode = #tpu.pipeline_mode<synchronous>, transform_indices = @transform_4, window_bounds = array<i64: 32, 1>}, {pipeline_mode = #tpu.pipeline_mode<synchronous>, transform_indices = @transform_5, window_bounds = array<i64: 2, 32>}, {pipeline_mode = #tpu.pipeline_mode<synchronous>, transform_indices = @transform_6, window_bounds = array<i64: 2, 1>}, {transform_indices = @transform_7, window_bounds = array<i64: 2, 256>}]} {
    %c0 = arith.constant 0 : index
    %c0_0 = arith.constant 0 : index
    %0 = vector.load %arg2[%c0, %c0_0] : memref<32x4xf32, #tpu.memory_space<vmem>>, vector<32x4xf32>
    %c0_1 = arith.constant 0 : index
    %c0_2 = arith.constant 0 : index
    %1 = vector.load %arg1[%c0_1, %c0_2] : memref<4x256xf32, #tpu.memory_space<vmem>>, vector<4x256xf32>
    %cst = arith.constant dense<0.000000e+00> : vector<32x256xf32>
    %2 = tpu.matmul %0, %1, %cst {dimension_numbers = #tpu.dot_dimension_numbers<[1], [0], [0], [1], [0, 0, 1, 1], [], []>} : vector<32x4xf32>, vector<4x256xf32>, vector<32x256xf32> -> vector<32x256xf32>
    %c0_3 = arith.constant 0 : index
    %c0_4 = arith.constant 0 : index
    %3 = vector.load %arg3[%c0_3, %c0_4] : memref<32x1xf32, #tpu.memory_space<vmem>>, vector<32x1xf32>
    %4 = vector.broadcast %3 : vector<32x1xf32> to vector<32x256xf32>
    %5 = arith.addf %2, %4 : vector<32x256xf32>
    %6 = math.tanh %5 : vector<32x256xf32>
    %c0_5 = arith.constant 0 : index
    %c0_6 = arith.constant 0 : index
    %7 = vector.load %arg4[%c0_5, %c0_6] : memref<32x32xf32, #tpu.memory_space<vmem>>, vector<32x32xf32>
    %cst_7 = arith.constant dense<0.000000e+00> : vector<32x256xf32>
    %8 = tpu.matmul %7, %6, %cst_7 {dimension_numbers = #tpu.dot_dimension_numbers<[1], [0], [0], [1], [0, 0, 1, 1], [], []>} : vector<32x32xf32>, vector<32x256xf32>, vector<32x256xf32> -> vector<32x256xf32>
    %c0_8 = arith.constant 0 : index
    %c0_9 = arith.constant 0 : index
    %9 = vector.load %arg5[%c0_8, %c0_9] : memref<32x1xf32, #tpu.memory_space<vmem>>, vector<32x1xf32>
    %10 = vector.broadcast %9 : vector<32x1xf32> to vector<32x256xf32>
    %11 = arith.addf %8, %10 : vector<32x256xf32>
    %12 = math.tanh %11 : vector<32x256xf32>
    %c0_10 = arith.constant 0 : index
    %c0_11 = arith.constant 0 : index
    %13 = vector.load %arg6[%c0_10, %c0_11] : memref<2x32xf32, #tpu.memory_space<vmem>>, vector<2x32xf32>
    %cst_12 = arith.constant dense<0.000000e+00> : vector<2x256xf32>
    %14 = tpu.matmul %13, %12, %cst_12 {dimension_numbers = #tpu.dot_dimension_numbers<[1], [0], [0], [1], [0, 0, 1, 1], [], []>} : vector<2x32xf32>, vector<32x256xf32>, vector<2x256xf32> -> vector<2x256xf32>
    %c0_13 = arith.constant 0 : index
    %c0_14 = arith.constant 0 : index
    %15 = vector.load %arg7[%c0_13, %c0_14] : memref<2x1xf32, #tpu.memory_space<vmem>>, vector<2x1xf32>
    %16 = vector.broadcast %15 : vector<2x1xf32> to vector<2x256xf32>
    %17 = arith.addf %14, %16 : vector<2x256xf32>
    %c0_15 = arith.constant 0 : index
    %c0_16 = arith.constant 0 : index
    %18 = vector.load %arg8[%c0_15, %c0_16] : memref<2x256xf32, #tpu.memory_space<vmem>>, vector<2x256xf32>
    tpu.vector_store %arg8[%c0_15, %c0_16], %17 {strides = array<i32>} : memref<2x256xf32, #tpu.memory_space<vmem>>, vector<2x256xf32>,
    return
  }
  func.func @transform_0(%arg0: i32) -> (i32, i32) {
    %c0_i32 = arith.constant 0 : i32
    %c0_i32_0 = arith.constant 0 : i32
    return %c0_i32, %arg0 : i32, i32
  }
  func.func @transform_1(%arg0: i32) -> (i32, i32) {
    %c0_i32 = arith.constant 0 : i32
    %c0_i32_0 = arith.constant 0 : i32
    %c0_i32_1 = arith.constant 0 : i32
    return %c0_i32, %c0_i32_0 : i32, i32
  }
  func.func @transform_2(%arg0: i32) -> (i32, i32) {
    %c0_i32 = arith.constant 0 : i32
    %c0_i32_0 = arith.constant 0 : i32
    %c0_i32_1 = arith.constant 0 : i32
    return %c0_i32, %c0_i32_0 : i32, i32
  }
  func.func @transform_3(%arg0: i32) -> (i32, i32) {
    %c0_i32 = arith.constant 0 : i32
    %c0_i32_0 = arith.constant 0 : i32
    %c0_i32_1 = arith.constant 0 : i32
    return %c0_i32, %c0_i32_0 : i32, i32
  }
  func.func @transform_4(%arg0: i32) -> (i32, i32) {
    %c0_i32 = arith.constant 0 : i32
    %c0_i32_0 = arith.constant 0 : i32
    %c0_i32_1 = arith.constant 0 : i32
    return %c0_i32, %c0_i32_0 : i32, i32
  }
  func.func @transform_5(%arg0: i32) -> (i32, i32) {
    %c0_i32 = arith.constant 0 : i32
    %c0_i32_0 = arith.constant 0 : i32
    %c0_i32_1 = arith.constant 0 : i32
    return %c0_i32, %c0_i32_0 : i32, i32
  }
  func.func @transform_6(%arg0: i32) -> (i32, i32) {
    %c0_i32 = arith.constant 0 : i32
    %c0_i32_0 = arith.constant 0 : i32
    %c0_i32_1 = arith.constant 0 : i32
    return %c0_i32, %c0_i32_0 : i32, i32
  }
  func.func @transform_7(%arg0: i32) -> (i32, i32) {
    %c0_i32 = arith.constant 0 : i32
    %c0_i32_0 = arith.constant 0 : i32
    return %c0_i32, %arg0 : i32, i32
  }
}

</mosaic_0001>

<bundles_post_ra>
// kernel: tpu_custom_call.1
= control target key start
LH: loop header
LB: loop body
LE: loop exit
PB: predicated region body
PF: predicated region fallthrough
CT: control target
= control target key end

     0   :  { %12 = vsyncpa [#allocation3], 0  ;;  %s1006_s0 = inlined_call_operand.vmem [shape: f32[4,512], index: 0, kind: input, shape index: {}]   ;;  %s1007_s1 = inlined_call_operand.vmem [shape: f32[32,4], index: 1, kind: input, shape index: {}]   ;;  %s1008_s2 = inlined_call_operand.vmem [shape: f32[32,1], index: 2, kind: input, shape index: {}]   ;;  %s1009_s3 = inlined_call_operand.vmem [shape: f32[32,32], index: 3, kind: input, shape index: {}]   ;;  %s1010_s4 = inlined_call_operand.vmem [shape: f32[32,1], index: 4, kind: input, shape index: {}]   ;;  %s1011_s5 = inlined_call_operand.vmem [shape: f32[2,32], index: 5, kind: input, shape index: {}]   ;;  %s1012_s6 = inlined_call_operand.vmem [shape: f32[2,1], index: 6, kind: input, shape index: {}]   ;;  %s1013_s7 = inlined_call_operand.hbm [shape: f32[2,512], index: 7, kind: output, shape index: {}]  }
   0x1   :  { %14 = vsyncpa [#allocation3 + $0x1], 0  ;;  %s850_s24 = smov 0   ;;  %s852_s25 = smov 0  }
   0x2   :  { %s854_s26 = smov 0   ;;  %s856_s27 = smov 0  }
   0x3 LB: > { %s871_s28 = sadd.s32 4294967295, %s807_s27   ;;  %s637_s29 = sadd.s32 4294967294, %s807_s27   ;;  %s807_s27 = sphi %s856_s27, %s1019_s27   ;;  %s803_s26 = sphi %s854_s26, %s1018_s26   ;;  %s799_s25 = sphi %s852_s25, %s1017_s25   ;;  %s795_s24 = sphi %s850_s24, %s1016_s24  }
   0x4   : > { %s875_s30 = sadd.s32 1, %s807_s27   ;;  %s179_s8 = sadd.s32 1, %s803_s26 }
   0x5   : > { %s176_s9 = ssub.s32 %s807_s27, %s875_s30  ;;  %p189_p0 = scmp.ne.s32.totalorder %s803_s26, %s799_s25 }
   0x6   : > { %p177_p1 = scmp.eq.s32.totalorder %s176_s9, 0  ;;  %p190_p2 = scmp.eq.s32.totalorder %s871_s28, 1 }
   0x7   : > { %p195_p3 = scmp.ne.s32.totalorder %s799_s25, %s795_s24  ;;  %p196_p4 = scmp.eq.s32.totalorder %s637_s29, 1 }
   0x8   : > { %s886_s10 = scalar_select %p177_p1, %s803_s26, %s179_s8  }
   0x9   : > { %p888_p5 = por %p190_p2, %p189_p0  ;;  %p892_p6 = por %p196_p4, %p195_p3 }
   0xa   : > { %p640_p7 = scmp.ge.s32.totalorder %s807_s27, 1  ;;  %p241_p8 = scmp.lt.s32.totalorder %s807_s27, 3 }
   0xc   : > { %p242_p9 = pnand %p640_p7, %p241_p8 }
   0xd   : > { %s642_s13 = sshll.u32 (!%p242_p9), %s871_s28, 1  ;;  %s270_s9 = sand.u32 (!%p242_p9), 1, %s799_s25  }
   0xe   : > { %245 = sbr.rel (%p242_p9) target bundleno = 505 (0x1f9), region = 48  ;;  %p274_p10 = scmp.lt.s32.totalorder (!%p242_p9), %s642_s13, 3 }
   0xf   : > { %s641_s14 = sshll.u32 (!%p242_p9), %s270_s9, 2  ;;  %s765_s8 = scalar_lea.hbm (!%p242_p9), %s1013_s7, 8 }
  0x13   : > { %v286_v0 = vld [vmem:[%s1008_s2 + $0x8] sm:$0xff]  ;;  %v809_v1 = vmov 0   ;;  %v288_v2 = vld [vmem:[%s1008_s2 + $0x18] sm:$0xff]  ;;  %s1021_s13 = smov (!%p274_p10, %s642_s13), 3  ;;  %v285_v4 = vld [vmem:[%s1008_s2] sm:$0xff]  ;;  %vm326_vm0 = vcmask 1043456  }
  0x14   : > { %711 = vset.pattern.permute.xlu1 %v809_v1  ;;  %710 = vset.pattern.permute.xlu0 %v809_v1  ;;  %s643_s18 = sshll.u32 %s1021_s13, 2  ;;  %v287_v5 = vld [vmem:[%s1008_s2 + $0x10] sm:$0xff]  ;;  %v280_v6 = vld [vmem:[%s1007_s1] sm:$0xff]  ;;  %vm313_vm1 = vcmask 31744   ;;  %v402_v7 = vld [vmem:[%s1010_s4 + $0x8] sm:$0xff]  ;;  %vm425_vm2 = vcmask 261120  }
  0x15   : > { %296 = vperm.xlu1 %711, %v286_v0   ;;  %306 = vperm.xlu0 %710, %v288_v2   ;;  %s277_s21 = scalar_lea.vmem %s1006_s0, %s643_s18  ;;  %v401_v8 = vld [vmem:[%s1010_s4] sm:$0xff]  ;;  %v281_v11 = vld [vmem:[%s1007_s1 + $0x8] sm:$0xff]  ;;  %v282_v12 = vld [vmem:[%s1007_s1 + $0x10] sm:$0xff]  ;;  %s669_s13 = sshll.u32 %s871_s28, 2  ;;  %vm557_vm3 = vcmask 1041408  }
  0x16   : > { %712 = vset.pattern.permute.xlu2 %v809_v1  ;;  %v284_v3 = vld [vmem:[%s277_s21] sm:$0xff]  ;;  %v283_v13 = vld [vmem:[%s1007_s1 + $0x18] sm:$0xff]  ;;  %v403_v44 = vld [vmem:[%s1010_s4 + $0x10] sm:$0xff]  ;;  %s573_s17 = scalar_lea.hbm %s1013_s7, %s669_s13  ;;  %s272_s18 = scalar_lea.vmem [#allocation2], %s641_s14 }
  0x17   : > { %310 = vst [vmem:[#allocation1] ss:$2 sm:$0xff] %v284_v3  ;;  %v404_v36 = vld [vmem:[%s1010_s4 + $0x18] sm:$0xff]  ;;  %v397_v41 = vld [vmem:[%s1009_s3] sm:$0xff]  ;;  %v398_v45 = vld [vmem:[%s1009_s3 + $0x8] sm:$0xff]  ;;  %s575_s19 = sshll.u32 %s272_s18, 4  ;;  %s576_s19 = int_to_ptr.vmem [resolvable:$true] %s575_s19 }
  0x18   : > { %422 = vperm.xlu2 %712, %v404_v36   ;;  %v505_v46 = vld [vmem:[%s1012_s6] sm:$0x3]  ;;  %v399_v47 = vld [vmem:[%s1009_s3 + $0x10] sm:$0xff]  ;;  %v400_v48 = vld [vmem:[%s1009_s3 + $0x18] sm:$0xff]  ;;  %s577_s20 = sshll.u32 %s573_s17, 4  ;;  %s562_s28 = scalar_lea.sflag [#allocation3], %s270_s9  ;;  %s578_s20 = int_to_ptr.hbm [resolvable:$true] %s577_s20 }
  0x19   : > { %s759_s21 = sshra.s32 %s578_s20, 4  ;;  %s760_s21 = int_to_ptr.hbm [resolvable:$true] %s759_s21 }
  0x1a   : > { %s761_s22 = scalar_lea.hbm %s760_s21, 4  ;;  %p766_p0 = scmp.lt.s32.totalorder %s760_s21, %s1013_s7 }
  0x1b   : > { %p762_p11 = scmp.ne.s32.totalorder %s760_s21, %s761_s22  ;;  %p767_p1 = scmp.lt.s32.totalorder %s765_s8, %s761_s22 }
  0x1d   : > { %291 = vperm.xlu1 %711, %v285_v4   ;;  %301 = vperm.xlu0 %710, %v287_v5   ;;  %p763_p12 = pnand %p762_p11, %p888_p5  ;;  %p768_p2 = por %p767_p1, %p766_p0 }
  0x1e   : > { %v311_v9 = vld.sshfl [vmem:[#allocation1] sm:$0xff pattern:$0x75316420]  ;;  %v312_v10 = vld.sshfl [vmem:[#allocation1 + $0x8] sm:$0xff pattern:$0x75316420] }
  0x1f   : > { %644 = vmatpush.msk.msra.mxu0 %vm326_vm0, %v311_v9  ;;  %649 = vmatpush.msk.msra.mxu1 %vm326_vm0, %v312_v10  ;;  %p764_p13 = pneg %p763_p12 }
  0x20   : > { %645 = vmatmul.msk.f32.vlgmr.msra.gmra.mxu0 %vm313_vm1, %v280_v6  ;;  %650 = vmatmul.msk.f32.vlgmr.msra.gmra.mxu1 %vm313_vm1, %v280_v6 }
  0x21   : > { %417 = vperm.xlu2 %712, %v403_v44   ;;  %p769_p3 = pnand %p768_p2, %p764_p13 }
  0x25   : > { %412 = vperm.xlu0 %710, %v402_v7   ;;  %407 = vperm.xlu1 %711, %v401_v8  }
  0x28   : > { %646 = vmatmul.msk.f32.gmra.mxu0 %vm313_vm1, %v281_v11  ;;  %651 = vmatmul.msk.f32.gmra.mxu1 %vm313_vm1, %v281_v11  ;;  %v504_v11 = vld [vmem:[%s1011_s5] sm:$0x3] }
  0x29   : > { %508 = vperm.xlu2 %712, %v505_v46  }
  0x30   : > { %647 = vmatmul.msk.f32.gmra.mxu0 %vm313_vm1, %v282_v12  ;;  %652 = vmatmul.msk.f32.gmra.mxu1 %vm313_vm1, %v282_v12 }
  0x38   : > { %648 = vmatmul.msk.f32.gmra.mxu0 %vm313_vm1, %v283_v13  ;;  %653 = vmatmul.msk.f32.gmra.mxu1 %vm313_vm1, %v283_v13 }
  0x72   : > { %v423_v53 = vpop.permute.xlu2 %422 }
  0x7b   : > { %v418_v56 = vpop.permute.xlu2 %417 }
  0x87   : > { %v307_v18 = vpop.permute.xlu0 %306  ;;  %v297_v21 = vpop.permute.xlu1 %296 }
  0x8f   : > { %v302_v22 = vpop.permute.xlu0 %301  ;;  %v292_v29 = vpop.permute.xlu1 %291 }
  0x97   : > { %v413_v61 = vpop.permute.xlu0 %412  ;;  %v408_v1 = vpop.permute.xlu1 %407 }
  0x9d   : > { %v348_v14 = vpop.f32.mrf.mxu0  ;;  %v377_v15 = vpop.f32.mrf.mxu1 }
  0x9e   : > { %v349_v32 = vadd.f32 %v348_v14, %v292_v29  ;;  %v378_v33 = vadd.f32 %v377_v15, %v292_v29  ;;  %v509_v14 = vpop.permute.xlu2 %508 }
  0xa5   : > { %v351_v16 = vpop.f32.mrf.mxu0  ;;  %v380_v17 = vpop.f32.mrf.mxu1 }
  0xa6   : > { %v352_v30 = vadd.f32 %v351_v16, %v297_v21  ;;  %v381_v31 = vadd.f32 %v380_v17, %v297_v21 }
  0xad   : > { %v354_v19 = vpop.f32.mrf.mxu0  ;;  %v383_v20 = vpop.f32.mrf.mxu1 }
  0xae   : > { %v355_v25 = vadd.f32 %v354_v19, %v302_v22  ;;  %v384_v28 = vadd.f32 %v383_v20, %v302_v22 }
  0xb5   : > { %v357_v23 = vpop.f32.mrf.mxu0  ;;  %v386_v24 = vpop.f32.mrf.mxu1 }
  0xb6   : > { %v358_v26 = vadd.f32 %v357_v23, %v307_v18  ;;  %v387_v27 = vadd.f32 %v386_v24, %v307_v18 }
  0xb8   : > { %713 = vtanh.f32 %v358_v26 }
  0xb9   : > { %715 = vtanh.f32 %v387_v27 }
  0xba   : > { %717 = vtanh.f32 %v355_v25 }
  0xbb   : > { %719 = vtanh.f32 %v384_v28 }
  0xbc   : > { %721 = vtanh.f32 %v352_v30 }
  0xbd   : > { %723 = vtanh.f32 %v381_v31 }
  0xbe   : > { %v714_v34 = vpop.eup %713  ;;  %725 = vtanh.f32 %v349_v32 }
  0xbf   : > { %v716_v35 = vpop.eup %715  ;;  %727 = vtanh.f32 %v378_v33  ;;  %450 = vmatpush.msra.mxu2 %v714_v34 }
  0xc0   : > { %v718_v37 = vpop.eup %717  ;;  %479 = vmatpush.msra.mxu3 %v716_v35 }
  0xc1   : > { %v720_v38 = vpop.eup %719  ;;  %451 = vmatpush.msra.mxu2 %v718_v37 }
  0xc2   : > { %v722_v39 = vpop.eup %721  ;;  %480 = vmatpush.msra.mxu3 %v720_v38 }
  0xc3   : > { %v724_v40 = vpop.eup %723  ;;  %452 = vmatpush.msra.mxu2 %v722_v39 }
  0xc4   : > { %v726_v42 = vpop.eup %725  ;;  %481 = vmatpush.msra.mxu3 %v724_v40 }
  0xc5   : > { %v728_v43 = vpop.eup %727  ;;  %453 = vmatpush.msra.mxu2 %v726_v42 }
  0xc6   : > { %482 = vmatpush.msra.mxu3 %v728_v43  ;;  %654 = vmatmul.msk.f32.vlgmr.msra.gmra.mxu2 %vm425_vm2, %v397_v41 }
  0xc7   : > { %658 = vmatmul.msk.f32.vlgmr.msra.gmra.mxu3 %vm425_vm2, %v397_v41 }
  0xce   : > { %655 = vmatmul.msk.f32.gmra.mxu2 %vm425_vm2, %v398_v45 }
  0xcf   : > { %659 = vmatmul.msk.f32.gmra.mxu3 %vm425_vm2, %v398_v45 }
  0xd6   : > { %656 = vmatmul.msk.f32.gmra.mxu2 %vm425_vm2, %v399_v47 }
  0xd7   : > { %660 = vmatmul.msk.f32.gmra.mxu3 %vm425_vm2, %v399_v47 }
  0xde   : > { %657 = vmatmul.msk.f32.gmra.mxu2 %vm425_vm2, %v400_v48 }
  0xdf   : > { %661 = vmatmul.msk.f32.gmra.mxu3 %vm425_vm2, %v400_v48 }
 0x149   : > { %v455_v49 = vpop.f32.mrf.mxu2 }
 0x14a   : > { %v484_v50 = vpop.f32.mrf.mxu3  ;;  %v456_v3 = vadd.f32 %v455_v49, %v408_v1 }
 0x14b   : > { %v485_v4 = vadd.f32 %v484_v50, %v408_v1 }
 0x151   : > { %v458_v51 = vpop.f32.mrf.mxu2 }
 0x152   : > { %v487_v52 = vpop.f32.mrf.mxu3  ;;  %v459_v0 = vadd.f32 %v458_v51, %v413_v61 }
 0x153   : > { %v488_v2 = vadd.f32 %v487_v52, %v413_v61 }
 0x159   : > { %v461_v54 = vpop.f32.mrf.mxu2 }
 0x15a   : > { %v490_v55 = vpop.f32.mrf.mxu3  ;;  %v462_v58 = vadd.f32 %v461_v54, %v418_v56 }
 0x15b   : > { %v491_v62 = vadd.f32 %v490_v55, %v418_v56 }
 0x161   : > { %v464_v57 = vpop.f32.mrf.mxu2 }
 0x162   : > { %v465_v59 = vadd.f32 %v464_v57, %v423_v53  ;;  %v493_v60 = vpop.f32.mrf.mxu3 }
 0x163   : > { %v494_v63 = vadd.f32 %v493_v60, %v423_v53 }
 0x164   : > { %729 = vtanh.f32 %v465_v59 }
 0x165   : > { %731 = vtanh.f32 %v494_v63 }
 0x166   : > { %733 = vtanh.f32 %v462_v58 }
 0x167   : > { %735 = vtanh.f32 %v491_v62 }
 0x168   : > { %737 = vtanh.f32 %v459_v0 }
 0x169   : > { %739 = vtanh.f32 %v488_v2 }
 0x16a   : > { %v730_v5 = vpop.eup %729  ;;  %741 = vtanh.f32 %v456_v3 }
 0x16b   : > { %v732_v6 = vpop.eup %731  ;;  %743 = vtanh.f32 %v485_v4  ;;  %526 = vmatpush.msrb.mxu0 %v730_v5 }
 0x16c   : > { %v734_v7 = vpop.eup %733  ;;  %546 = vmatpush.msrb.mxu1 %v732_v6 }
 0x16d   : > { %v736_v8 = vpop.eup %735  ;;  %527 = vmatpush.msrb.mxu0 %v734_v7 }
 0x16e   : > { %v738_v9 = vpop.eup %737  ;;  %547 = vmatpush.msrb.mxu1 %v736_v8 }
 0x16f   : > { %v740_v10 = vpop.eup %739  ;;  %528 = vmatpush.msrb.mxu0 %v738_v9 }
 0x170   : > { %v742_v12 = vpop.eup %741  ;;  %548 = vmatpush.msrb.mxu1 %v740_v10 }
 0x171   : > { %v744_v13 = vpop.eup %743  ;;  %529 = vmatpush.msrb.mxu0 %v742_v12 }
 0x172   : > { %549 = vmatpush.msrb.mxu1 %v744_v13  ;;  %662 = vmatmul.msk.f32.vlgmr.msrb.gmra.mxu0 %vm425_vm2, %v504_v11 }
 0x173   : > { %663 = vmatmul.msk.f32.vlgmr.msrb.gmra.mxu1 %vm425_vm2, %v504_v11 }
 0x1ef   : > { %v531_v15 = vpop.f32.mrf.mxu0 }
 0x1f0   : > { %v551_v16 = vpop.f32.mrf.mxu1  ;;  %v532_v18 = vadd.f32 %v531_v15, %v509_v14 }
 0x1f1   : > { %v552_v17 = vadd.f32 %v551_v16, %v509_v14 }
 0x1f3   : > { %v556_v19 = vrot.slane %v552_v17, 6 }
 0x1f5   : > { %v558_v20 = vsel %vm557_vm3, %v532_v18, %v556_v19 }
 0x1f6   : > { %560 = vst [vmem:[%s272_s18] sm:$0xf] %v558_v20 }
 0x1f7   : > { %772 = shalt.err (!%p769_p3)
}
 0x1f8   : > { %670 = dma.vmem_to_hbm [thread:$0]  (%p888_p5), %s576_s19, 64, %s578_s20, %s562_s28  }
 0x1f9 PF: > { %p676_p4 = scmp.ge.s32.totalorder %s807_s27, 2  ;;  %s589_s9 = sand.u32 1, %s795_s24  }
 0x1fa   : > { %s590_s15 = scalar_lea.sflag [#allocation3], %s589_s9 }
 0x1fb   : > { %p673_p7 = pnand %p676_p4, %p892_p6 }
 0x1fd   : > { %p674_p8 = pneg %p673_p7 }
 0x1ff   : > { %790 = dma.done.wait (%p674_p8), %s590_s15, 64  }
 0x200   : > { %792 = vsyncadd (%p674_p8), %s590_s15, 4294967232  ;;  %p17_p9 = scmp.ge.s32.totalorder %s875_s30, 4   ;;  %s1016_s24 = smov %s799_s25 }
 0x201   : > { %s1017_s25 = smov %s803_s26  ;;  %s1018_s26 = smov %s886_s10 }
 0x202   : > { %s1019_s27 = smov %s875_s30  ;;  %19 = sbr.rel (!%p17_p9) target bundleno = 3 (0x3), region = 83 }
 0x207   :  { %596 = vsyncpa [#allocation3], 1 }
 0x208   :  { %598 = vsyncpa [#allocation3 + $0x1], 1 }

</bundles_post_ra>
